<compile_context>
chip_gen: v5e
topology: v5e:2x2
jax: 0.10.0
libtpu: 0.0.40
codegen_flags: <defaults>
</compile_context>

<pallas_src>
import functools
from collections import defaultdict

import jax
import jax.numpy as jnp
from jax.experimental import pallas as pl
from jax.experimental.pallas import tpu as pltpu

LANE = 128      # feature dims padded to multiples of the 128-lane vreg width
TILE_N = 256    # node rows per block (256+ rows ~ HBM-roofline per measured sweep)
TILE_M = 256    # messages per block (shared by msg-matmul and scatter kernels)


def _round_up(x, m):
    return ((x + m - 1) // m) * m


# ----------------------------- Pallas kernels -------------------------------

def edge_msgs_kernel(tmp_ref, a_ref, norm_ref, o_ref):
    """msgs = (gathered hyperedge source feats @ A_e) * (1/deg).

    bf16 MXU inputs, f32 accumulation; norm (1/degree) is structure-only and
    precomputed once outside the layer loop.
    """
    m = jnp.dot(tmp_ref[...], a_ref[...], preferred_element_type=jnp.float32)
    o_ref[...] = (m * norm_ref[...]).astype(o_ref.dtype)


def fused_layer_kernel(dest_ref, msgs_ref, x_ref, w_ref, b_ref, o_ref, acc_ref,
                       *, act, slope):
    """Fused scatter-add + node linear + activation.

    grid = (node_blocks, msg_blocks).  For each node block, accumulate the
    scatter-add of every message block via a block-local (TILE_N, TILE_M)
    one-hot matmul into a VMEM f32 scratch; on the last message block fuse
    x @ C_w + C_b + agg and the activation and store the lane-dense output once.
    """
    j = pl.program_id(1)

    @pl.when(j == 0)
    def _init():
        acc_ref[...] = jnp.zeros_like(acc_ref)

    tile_n = acc_ref.shape[0]
    tile_m = dest_ref.shape[1]
    node_base = pl.program_id(0) * tile_n
    node_ids = node_base + jax.lax.broadcasted_iota(jnp.int32, (tile_n, tile_m), 0)
    onehot = (node_ids == dest_ref[...]).astype(jnp.bfloat16)        # (tile_n, tile_m)
    acc_ref[...] += jnp.dot(onehot, msgs_ref[...],
                            preferred_element_type=jnp.float32)

    @pl.when(j == pl.num_programs(1) - 1)
    def _finalize():
        h = (acc_ref[...]
             + jnp.dot(x_ref[...].astype(jnp.bfloat16), w_ref[...],
                       preferred_element_type=jnp.float32)
             + b_ref[...])
        if act == "leaky_relu":
            h = jnp.where(h >= 0.0, h, slope * h)
        elif act == "sigmoid":
            h = jax.nn.sigmoid(h)
        # act == "none": logits passthrough
        o_ref[...] = h


# ----------------------------- pallas_call wrappers --------------------------

def pallas_edge_msgs(tmp_bf16, a_bf16, norm):
    k_pad, kdim = tmp_bf16.shape
    dout_pad = a_bf16.shape[1]
    return pl.pallas_call(
        edge_msgs_kernel,
        out_shape=jax.ShapeDtypeStruct((k_pad, dout_pad), jnp.bfloat16),
        grid_spec=pltpu.PrefetchScalarGridSpec(
            num_scalar_prefetch=0,
            grid=(k_pad // TILE_M,),
            in_specs=[
                pl.BlockSpec((TILE_M, kdim), lambda i: (i, 0)),      # gathered feats
                pl.BlockSpec((kdim, dout_pad), lambda i: (0, 0)),    # A_e (resident)
                pl.BlockSpec((TILE_M, 1), lambda i: (i, 0)),         # 1/deg per msg
            ],
            out_specs=pl.BlockSpec((TILE_M, dout_pad), lambda i: (i, 0)),
        ),
        compiler_params=pltpu.CompilerParams(dimension_semantics=("parallel",)),
    )(tmp_bf16, a_bf16, norm)


def pallas_fused_layer(x_pad, c_w, c_b, dest_all, msgs_all, act, slope):
    n_pad, din_pad = x_pad.shape
    dout_pad = c_w.shape[1]
    m_pad = msgs_all.shape[0]
    kernel = functools.partial(fused_layer_kernel, act=act, slope=slope)
    return pl.pallas_call(
        kernel,
        out_shape=jax.ShapeDtypeStruct((n_pad, dout_pad), jnp.float32),
        grid_spec=pltpu.PrefetchScalarGridSpec(
            num_scalar_prefetch=0,
            grid=(n_pad // TILE_N, m_pad // TILE_M),
            in_specs=[
                pl.BlockSpec((1, TILE_M), lambda i, j: (0, j)),           # dest ids
                pl.BlockSpec((TILE_M, dout_pad), lambda i, j: (j, 0)),    # messages
                pl.BlockSpec((TILE_N, din_pad), lambda i, j: (i, 0)),     # node feats
                pl.BlockSpec((din_pad, dout_pad), lambda i, j: (0, 0)),   # C_w
                pl.BlockSpec((1, dout_pad), lambda i, j: (0, 0)),         # C_b
            ],
            out_specs=pl.BlockSpec((TILE_N, dout_pad), lambda i, j: (i, 0)),
            scratch_shapes=[pltpu.VMEM((TILE_N, dout_pad), jnp.float32)],
        ),
        compiler_params=pltpu.CompilerParams(
            dimension_semantics=("parallel", "arbitrary")),
    )(dest_all, msgs_all, x_pad, c_w, c_b)


# ----------------------------- structure-only precompute ---------------------

def build_plan(shapes_dict, indices_dict, n_nodes):
    """Structure-only preprocessing (padded src indices, dest ids, 1/degree norm).

    Depends only on the hypergraph, so it is computed once per forward pass and
    shared by every layer (matches torch.unique + counts per edge type).
    """
    edges = []
    dest_segments = []
    for edge, edge_indices in indices_dict.items():
        if edge not in shapes_dict or edge_indices.size == 0:
            continue
        s = shapes_dict[edge]
        assert edge_indices.shape[1] % s == 0, \
            "edge index length must be divisible by hyperedge arity"
        k = edge_indices.shape[1] // s
        k_pad = _round_up(k, TILE_M)

        src = edge_indices[0].astype(jnp.int32)                                # (k*s,)
        dest = jnp.reshape(edge_indices[1], (-1, s))[:, 0].astype(jnp.int32)   # (k,)

        deg = jnp.zeros((n_nodes,), jnp.float32).at[dest].add(1.0)
        norm = 1.0 / deg[dest]                                                 # (k,)

        # padded rows: src -> row 0 (harmless), norm -> 0 (kills the message),
        # dest -> -1 (never matches a node id)
        src_pad = jnp.zeros((k_pad * s,), jnp.int32).at[: k * s].set(src)
        norm_pad = jnp.zeros((k_pad, 1), jnp.float32).at[:k, 0].set(norm)
        dest_pad = jnp.full((k_pad,), -1, jnp.int32).at[:k].set(dest)

        edges.append({"edge": edge, "s": s, "src": src_pad, "norm": norm_pad})
        dest_segments.append(dest_pad)

    if dest_segments:
        dest_all = jnp.concatenate(dest_segments)[None, :]                     # (1, M_pad)
    else:
        dest_all = jnp.full((1, TILE_M), -1, jnp.int32)
    return {"edges": edges, "dest_all": dest_all}


# ----------------------------- model (glue in JAX) ---------------------------

def hgnn_layer_forward(layer_params, plan, x_pad, act, slope):
    din_pad = x_pad.shape[1]
    dout_pad = layer_params["C_w"].shape[1]

    msgs_segments = []
    for seg in plan["edges"]:
        # TODO(synk): the data-dependent row gather stays as an XLA gather; an
        # in-kernel DMA gather (PrefetchScalarGridSpec + manual copies) would remove
        # one HBM round trip of the message tensor per edge type.
        tmp = x_pad[seg["src"]]                                    # (K_pad*s, Din_pad)
        tmp = tmp.reshape(-1, seg["s"] * din_pad).astype(jnp.bfloat16)
        msgs_segments.append(
            pallas_edge_msgs(tmp, layer_params["A"][seg["edge"]], seg["norm"]))

    if msgs_segments:
        msgs_all = jnp.concatenate(msgs_segments, axis=0)          # (M_pad, Dout_pad)
    else:
        msgs_all = jnp.zeros((TILE_M, dout_pad), jnp.bfloat16)
    dest_all = plan["dest_all"]

    return pallas_fused_layer(x_pad, layer_params["C_w"], layer_params["C_b"],
                              dest_all, msgs_all, act, slope)


def hgnn_forward(padded_params, plan, x, n_nodes, negative_slope=0.1, logits=False):
    feat = x.shape[1]
    n_pad = _round_up(max(n_nodes, 1), TILE_N)
    feat_pad = _round_up(feat, LANE)
    x_pad = jnp.zeros((n_pad, feat_pad), jnp.float32).at[:n_nodes, :feat].set(
        x.astype(jnp.float32))

    num_layers = len(padded_params)
    for i in range(num_layers - 1):
        x_pad = hgnn_layer_forward(padded_params[i], plan, x_pad,
                                   "leaky_relu", negative_slope)
    final_act = "none" if logits else "sigmoid"
    x_pad = hgnn_layer_forward(padded_params[-1], plan, x_pad,
                               final_act, negative_slope)
    return x_pad[:n_nodes, :padded_params[-1]["out_dim"]]


# ----------------------------- params ----------------------------------------

def init_hgnn_params(key, feat_dim, base_dim, shapes_dict, num_layers):
    dims = ([(feat_dim, base_dim)]
            + [(base_dim, base_dim)] * (num_layers - 2)
            + [(base_dim, 1)])
    shape_nums = defaultdict(int)
    for _, s in shapes_dict.items():
        shape_nums[s] += 1

    params = []
    for (din, dout) in dims:
        key, kw, kb = jax.random.split(key, 3)
        bound = 1.0 / (din ** 0.5)                      # torch.nn.Linear default init
        c_w = jax.random.uniform(kw, (din, dout), jnp.float32, -bound, bound)
        c_b = jax.random.uniform(kb, (1, dout), jnp.float32, -bound, bound)
        a_params = {}
        for edge, s in shapes_dict.items():
            key, ka = jax.random.split(key)
            std = (2.0 / (shape_nums[s] * din * s + shape_nums[s] * dout)) ** 0.5
            a_params[edge] = std * jax.random.normal(ka, (din * s, dout), jnp.float32)
        params.append({"C_w": c_w, "C_b": c_b, "A": a_params,
                       "din": din, "dout": dout})
    return params


def pad_params(params, shapes_dict):
    """Zero-pad feature dims to 128-lane multiples; cast MXU operands to bf16."""
    padded = []
    for p in params:
        din, dout = p["din"], p["dout"]
        din_pad, dout_pad = _round_up(din, LANE), _round_up(dout, LANE)
        c_w = jnp.zeros((din_pad, dout_pad), jnp.float32).at[:din, :dout].set(p["C_w"])
        c_b = jnp.zeros((1, dout_pad), jnp.float32).at[:, :dout].set(p["C_b"])
        a_pad = {}
        for edge, a in p["A"].items():
            s = shapes_dict[edge]
            a3 = a.reshape(s, din, dout)
            a3p = jnp.zeros((s, din_pad, dout_pad),
                            jnp.float32).at[:, :din, :dout].set(a3)
            a_pad[edge] = a3p.reshape(s * din_pad, dout_pad).astype(jnp.bfloat16)
        padded.append({"C_w": c_w.astype(jnp.bfloat16), "C_b": c_b,
                       "A": a_pad, "out_dim": dout})
    return padded


# ----------------------------- demo -----------------------------------------

if __name__ == "__main__":
    key = jax.random.PRNGKey(0)
    n_nodes, feat_dim, base_dim, num_layers = 16, 8, 32, 3
    shapes_dict = {"e1": 2, "e2": 3}   # hyperedge arities

    k_x, k_e1, k_e2, k_p = jax.random.split(key, 4)
    x = jax.random.normal(k_x, (n_nodes, feat_dim), jnp.float32)
    # edge "e1": 4 hyperedges of arity 2 -> indices (2, 8)
    e1 = jax.random.randint(k_e1, (2, 8), 0, n_nodes, jnp.int32)
    # edge "e2": 3 hyperedges of arity 3 -> indices (2, 9)
    e2 = jax.random.randint(k_e2, (2, 9), 0, n_nodes, jnp.int32)
    indices_dict = {"e1": e1, "e2": e2}

    params = init_hgnn_params(k_p, feat_dim, base_dim, shapes_dict, num_layers)
    padded_params = pad_params(params, shapes_dict)
    plan = build_plan(shapes_dict, indices_dict, n_nodes)   # structure-only, reused by all layers

    out = hgnn_forward(padded_params, plan, x, n_nodes)
    out = jax.block_until_ready(out)
    assert out.shape == (n_nodes, 1)
    assert bool(jnp.all(jnp.isfinite(out)))
    print("KERNEL_OK")
</pallas_src>

<mosaic_0001>
module attributes {stable_mosaic.version = 11 : i64} {
  func.func @edge_msgs_kernel(%arg0: i32, %arg1: memref<256x256xbf16, #tpu.memory_space<vmem>>, %arg2: memref<256x128xbf16, #tpu.memory_space<vmem>>, %arg3: memref<256x1xf32, #tpu.memory_space<vmem>>, %arg4: memref<256x128xbf16, #tpu.memory_space<vmem>>) attributes {dimension_semantics = [#tpu.dimension_semantics<parallel>], iteration_bounds = array<i64: 1>, scalar_prefetch = 0 : i64, scratch_operands = 0 : i64, tpu.core_type = #tpu.core_type<tc>, window_params = [{transform_indices = @transform_0, window_bounds = array<i64: 256, 256>}, {pipeline_mode = #tpu.pipeline_mode<synchronous>, transform_indices = @transform_1, window_bounds = array<i64: 256, 128>}, {transform_indices = @transform_2, window_bounds = array<i64: 256, 1>}, {transform_indices = @transform_3, window_bounds = array<i64: 256, 128>}]} {
    %c0 = arith.constant 0 : index
    %c0_0 = arith.constant 0 : index
    %0 = vector.load %arg1[%c0, %c0_0] : memref<256x256xbf16, #tpu.memory_space<vmem>>, vector<256x256xbf16>
    %c0_1 = arith.constant 0 : index
    %c0_2 = arith.constant 0 : index
    %1 = vector.load %arg2[%c0_1, %c0_2] : memref<256x128xbf16, #tpu.memory_space<vmem>>, vector<256x128xbf16>
    %cst = arith.constant dense<0.000000e+00> : vector<256x128xf32>
    %2 = tpu.matmul %0, %1, %cst {dimension_numbers = #tpu.dot_dimension_numbers<[1], [0], [0], [1], [0, 0, 1, 1], [], []>} : vector<256x256xbf16>, vector<256x128xbf16>, vector<256x128xf32> -> vector<256x128xf32>
    %c0_3 = arith.constant 0 : index
    %c0_4 = arith.constant 0 : index
    %3 = vector.load %arg3[%c0_3, %c0_4] : memref<256x1xf32, #tpu.memory_space<vmem>>, vector<256x1xf32>
    %4 = vector.broadcast %3 : vector<256x1xf32> to vector<256x128xf32>
    %5 = arith.mulf %2, %4 : vector<256x128xf32>
    %6 = arith.truncf %5 : vector<256x128xf32> to vector<256x128xbf16>
    %c0_5 = arith.constant 0 : index
    %c0_6 = arith.constant 0 : index
    %7 = vector.load %arg4[%c0_5, %c0_6] : memref<256x128xbf16, #tpu.memory_space<vmem>>, vector<256x128xbf16>
    tpu.vector_store %arg4[%c0_5, %c0_6], %6 {strides = array<i32>} : memref<256x128xbf16, #tpu.memory_space<vmem>>, vector<256x128xbf16>,
    return
  }
  func.func @transform_0(%arg0: i32) -> (i32, i32) {
    %c0_i32 = arith.constant 0 : i32
    %c0_i32_0 = arith.constant 0 : i32
    return %arg0, %c0_i32 : i32, i32
  }
  func.func @transform_1(%arg0: i32) -> (i32, i32) {
    %c0_i32 = arith.constant 0 : i32
    %c0_i32_0 = arith.constant 0 : i32
    %c0_i32_1 = arith.constant 0 : i32
    return %c0_i32, %c0_i32_0 : i32, i32
  }
  func.func @transform_2(%arg0: i32) -> (i32, i32) {
    %c0_i32 = arith.constant 0 : i32
    %c0_i32_0 = arith.constant 0 : i32
    return %arg0, %c0_i32 : i32, i32
  }
  func.func @transform_3(%arg0: i32) -> (i32, i32) {
    %c0_i32 = arith.constant 0 : i32
    %c0_i32_0 = arith.constant 0 : i32
    return %arg0, %c0_i32 : i32, i32
  }
}

</mosaic_0001>

<bundles_post_ra>
// kernel: tpu_custom_call.1
= control target key start
LH: loop header
LB: loop body
LE: loop exit
PB: predicated region body
PF: predicated region fallthrough
CT: control target
= control target key end

     0   :  { %8 = vsyncpa [#allocation3], 0  ;;  %s1611_s0 = inlined_call_operand.vmem [shape: bf16[256,256], index: 0, kind: input, shape index: {}]   ;;  %s1612_s1 = inlined_call_operand.hbm [shape: bf16[256,128], index: 1, kind: input, shape index: {}]   ;;  %s1613_s2 = inlined_call_operand.vmem [shape: f32[256,1], index: 2, kind: input, shape index: {}]   ;;  %s1614_s3 = inlined_call_operand.hbm [shape: bf16[256,128], index: 3, kind: output, shape index: {}]  }
   0x1   :  { %9 = vsyncpa [#allocation4], 0  ;;  %s16_s14 = sshll.u32 %s1612_s1, 4  ;;  %s1247_s15 = smov [#allocation2]   ;;  %s17_s14 = int_to_ptr.hbm [resolvable:$true] %s16_s14 }
   0x2   :  { %s18_s16 = sshll.u32 %s1247_s15, 4  ;;  %s1248_s17 = smov 64   ;;  %s19_s16 = int_to_ptr.vmem [resolvable:$true] %s18_s16 }
   0x3   :  { %s1249_s18 = smov 4  }
   0x4   :  { %24 = dma.hbm_to_vmem [thread:$0]  %s17_s14, 2048, %s19_s16, [#allocation3], %s1248_s17, %s1248_s17, %s1249_s18  }
   0x5   :  { %1243 = dma.done.wait [#allocation3], 2048  }
   0x6   :  { %1244 = vsyncadd [#allocation3], 4294965248  ;;  %v1250_v0 = vmov 0   ;;  %v1067_v1 = vld [vmem:[#allocation2 + $0x38] sm:$0xff]  ;;  %v1066_v3 = vld [vmem:[#allocation2 + $0x30] sm:$0xff]  ;;  %s823_s28 = sshll.u32 %s1614_s3, 4  ;;  %s824_s28 = int_to_ptr.hbm [resolvable:$true] %s823_s28 }
   0x7   :  { %1193 = vset.pattern.permute.xlu1 %v1250_v0  ;;  %1192 = vset.pattern.permute.xlu0 %v1250_v0  ;;  %v1075_v2 = vld [vmem:[#allocation2 + $0x78] sm:$0xff]  ;;  %v531_v4 = vld [vmem:[%s1613_s2 + $0x10] sm:$0xff]  ;;  %v529_v5 = vld [vmem:[%s1613_s2] sm:$0xff] }
   0x8   :  { %1194 = vset.pattern.permute.xlu2 %v1250_v0  ;;  %351 = vmatpush.bf16.msra.mxu0 %v1067_v1  ;;  %v1074_v6 = vld [vmem:[#allocation2 + $0x70] sm:$0xff]  ;;  %v1065_v7 = vld [vmem:[#allocation2 + $0x28] sm:$0xff]  ;;  %v532_v9 = vld [vmem:[%s1613_s2 + $0x18] sm:$0xff] }
   0x9   :  { %1171 = vmatpush.bf16.msra.mxu2 %v1067_v1  ;;  %440 = vmatpush.bf16.msra.mxu1 %v1075_v2  ;;  %v1073_v8 = vld [vmem:[#allocation2 + $0x68] sm:$0xff]  ;;  %v1064_v11 = vld [vmem:[#allocation2 + $0x20] sm:$0xff]  ;;  %v1063_v14 = vld [vmem:[#allocation2 + $0x18] sm:$0xff] }
   0xa   :  { %1179 = vmatpush.bf16.msra.mxu3 %v1075_v2  ;;  %573 = vperm.xlu1 %1193, %v531_v4   ;;  %v530_v10 = vld [vmem:[%s1613_s2 + $0x8] sm:$0xff]  ;;  %v533_v12 = vld [vmem:[%s1613_s2 + $0x20] sm:$0xff]  ;;  %v1071_v15 = vld [vmem:[#allocation2 + $0x58] sm:$0xff] }
   0xb   :  { %563 = vperm.xlu0 %1192, %v529_v5   ;;  %v1072_v13 = vld [vmem:[#allocation2 + $0x60] sm:$0xff]  ;;  %583 = vperm.xlu2 %1194, %v533_v12   ;;  %v536_v16 = vld [vmem:[%s1613_s2 + $0x38] sm:$0xff]  ;;  %v535_v17 = vld [vmem:[%s1613_s2 + $0x30] sm:$0xff] }
   0xc   :  { %352 = vmatpush.bf16.msra.mxu0 %v1066_v3  ;;  %v1062_v18 = vld [vmem:[#allocation2 + $0x10] sm:$0xff]  ;;  %v534_v19 = vld [vmem:[%s1613_s2 + $0x28] sm:$0xff]  ;;  %v1060_v23 = vld [vmem:[#allocation2] sm:$0xff] }
   0xd   :  { %1172 = vmatpush.bf16.msra.mxu2 %v1066_v3  ;;  %441 = vmatpush.bf16.msra.mxu1 %v1074_v6  ;;  %v1070_v20 = vld [vmem:[#allocation2 + $0x50] sm:$0xff]  ;;  %v1061_v21 = vld [vmem:[#allocation2 + $0x8] sm:$0xff]  ;;  %v838_v24 = vld [vmem:[%s1611_s0] sm:$0xf] }
   0xe   :  { %1180 = vmatpush.bf16.msra.mxu3 %v1074_v6  ;;  %v1069_v22 = vld [vmem:[#allocation2 + $0x48] sm:$0xff]  ;;  %v1068_v26 = vld [vmem:[#allocation2 + $0x40] sm:$0xff]  ;;  %v539_v28 = vld [vmem:[%s1613_s2 + $0x50] sm:$0xff] }
   0xf   :  { %v1029_v25 = vld [vmem:[%s1611_s0 + $0x4] sm:$0xf0]  ;;  %v902_v27 = vld [vmem:[%s1611_s0 + $0x80] sm:$0xf]  ;;  %v1028_v31 = vld [vmem:[%s1611_s0 + $0x4] sm:$0xf] }
  0x10   :  { %353 = vmatpush.bf16.msra.mxu0 %v1065_v7  ;;  %v538_v29 = vld [vmem:[%s1613_s2 + $0x48] sm:$0xff]  ;;  %v537_v32 = vld [vmem:[%s1613_s2 + $0x40] sm:$0xff]  ;;  %v839_v36 = vor.u32 %v1029_v25, %v838_v24  ;;  %v540_v42 = vld [vmem:[%s1613_s2 + $0x58] sm:$0xff] }
  0x11   :  { %1173 = vmatpush.bf16.msra.mxu2 %v1065_v7  ;;  %442 = vmatpush.bf16.msra.mxu1 %v1073_v8  ;;  %v1045_v30 = vld [vmem:[%s1611_s0 + $0x84] sm:$0xf0]  ;;  %v840_v33 = vld [vmem:[%s1611_s0 + $0x8] sm:$0xf0]  ;;  %v1044_v34 = vld [vmem:[%s1611_s0 + $0x84] sm:$0xf] }
  0x12   :  { %1181 = vmatpush.bf16.msra.mxu3 %v1073_v8  ;;  %578 = vperm.xlu1 %1193, %v532_v9   ;;  %v904_v35 = vld [vmem:[%s1611_s0 + $0x88] sm:$0xf0]  ;;  %v903_v37 = vor.u32 %v1045_v30, %v902_v27  ;;  %v843_v38 = vor.u32 %v1028_v31, %v840_v33  ;;  %v541_v41 = vld [vmem:[%s1613_s2 + $0x60] sm:$0xff]  ;;  %v846_v43 = vld [vmem:[%s1611_s0 + $0x10] sm:$0xf] }
  0x13   :  { %568 = vperm.xlu0 %1192, %v530_v10   ;;  %588 = vperm.xlu2 %1194, %v534_v19   ;;  %v907_v39 = vor.u32 %v1044_v34, %v904_v35  ;;  %v542_v40 = vld [vmem:[%s1613_s2 + $0x68] sm:$0xff]  ;;  %v1031_v44 = vld [vmem:[%s1611_s0 + $0x14] sm:$0xf0]  ;;  %v910_v45 = vld [vmem:[%s1611_s0 + $0x90] sm:$0xf] }
  0x14   :  { %354 = vmatpush.bf16.msra.mxu0 %v1064_v11  ;;  %v545_v46 = vld [vmem:[%s1613_s2 + $0x80] sm:$0xff]  ;;  %v544_v47 = vld [vmem:[%s1613_s2 + $0x78] sm:$0xff]  ;;  %v1030_v49 = vld [vmem:[%s1611_s0 + $0x14] sm:$0xf]  ;;  %v847_v54 = vor.u32 %v1031_v44, %v846_v43 }
  0x15   :  { %1174 = vmatpush.bf16.msra.mxu2 %v1064_v11  ;;  %443 = vmatpush.bf16.msra.mxu1 %v1072_v13  ;;  %v1047_v48 = vld [vmem:[%s1611_s0 + $0x94] sm:$0xf0]  ;;  %v543_v50 = vld [vmem:[%s1613_s2 + $0x70] sm:$0xff]  ;;  %v848_v51 = vld [vmem:[%s1611_s0 + $0x18] sm:$0xf0] }
  0x16   :  { %1182 = vmatpush.bf16.msra.mxu3 %v1072_v13  ;;  %v1046_v52 = vld [vmem:[%s1611_s0 + $0x94] sm:$0xf]  ;;  %v912_v53 = vld [vmem:[%s1611_s0 + $0x98] sm:$0xf0]  ;;  %v911_v55 = vor.u32 %v1047_v48, %v910_v45  ;;  %v851_v56 = vor.u32 %v1030_v49, %v848_v51  ;;  %v546_v60 = vld [vmem:[%s1613_s2 + $0x88] sm:$0xff] }
  0x17   :  { %v915_v57 = vor.u32 %v1046_v52, %v912_v53  ;;  %v548_v58 = vld [vmem:[%s1613_s2 + $0x98] sm:$0xff]  ;;  %v547_v59 = vld [vmem:[%s1613_s2 + $0x90] sm:$0xff]  ;;  %v854_v61 = vld [vmem:[%s1611_s0 + $0x20] sm:$0xf] }
  0x18   :  { %355 = vmatpush.bf16.msra.mxu0 %v1063_v14  ;;  %v1033_v62 = vld [vmem:[%s1611_s0 + $0x24] sm:$0xf0]  ;;  %v551_v63 = vld [vmem:[%s1613_s2 + $0xb0] sm:$0xff]  ;;  %v918_v1 = vld [vmem:[%s1611_s0 + $0xa0] sm:$0xf] }
  0x19   :  { %1175 = vmatpush.bf16.msra.mxu2 %v1063_v14  ;;  %444 = vmatpush.bf16.msra.mxu1 %v1071_v15  ;;  %v550_v0 = vld [vmem:[%s1613_s2 + $0xa8] sm:$0xff]  ;;  %v1032_v3 = vld [vmem:[%s1611_s0 + $0x24] sm:$0xf]  ;;  %v855_v7 = vor.u32 %v1033_v62, %v854_v61  ;;  %v862_v14 = vld [vmem:[%s1611_s0 + $0x30] sm:$0xf] }
  0x1a   :  { %1183 = vmatpush.bf16.msra.mxu3 %v1071_v15  ;;  %598 = vperm.xlu1 %1193, %v536_v16   ;;  %v1049_v2 = vld [vmem:[%s1611_s0 + $0xa4] sm:$0xf0]  ;;  %v856_v4 = vld [vmem:[%s1611_s0 + $0x28] sm:$0xf0]  ;;  %v1048_v5 = vld [vmem:[%s1611_s0 + $0xa4] sm:$0xf] }
  0x1b   :  { %593 = vperm.xlu0 %1192, %v535_v17   ;;  %603 = vperm.xlu2 %1194, %v537_v32   ;;  %v920_v6 = vld [vmem:[%s1611_s0 + $0xa8] sm:$0xf0]  ;;  %v919_v8 = vor.u32 %v1049_v2, %v918_v1  ;;  %v859_v9 = vor.u32 %v1032_v3, %v856_v4  ;;  %v553_v12 = vld [vmem:[%s1613_s2 + $0xc0] sm:$0xff]  ;;  %v552_v15 = vld [vmem:[%s1613_s2 + $0xb8] sm:$0xff] }
  0x1c   :  { %356 = vmatpush.bf16.msra.mxu0 %v1062_v18  ;;  %v923_v10 = vor.u32 %v1048_v5, %v920_v6  ;;  %v554_v11 = vld [vmem:[%s1613_s2 + $0xc8] sm:$0xff]  ;;  %v549_v13 = vld [vmem:[%s1613_s2 + $0xa0] sm:$0xff]  ;;  %v1035_v16 = vld [vmem:[%s1611_s0 + $0x34] sm:$0xf0] }
  0x1d   :  { %1176 = vmatpush.bf16.msra.mxu2 %v1062_v18  ;;  %445 = vmatpush.bf16.msra.mxu1 %v1070_v20  ;;  %v557_v17 = vld [vmem:[%s1613_s2 + $0xe0] sm:$0xff]  ;;  %v556_v18 = vld [vmem:[%s1613_s2 + $0xd8] sm:$0xff]  ;;  %v926_v19 = vld [vmem:[%s1611_s0 + $0xb0] sm:$0xf]  ;;  %v863_v25 = vor.u32 %v1035_v16, %v862_v14 }
  0x1e   :  { %1184 = vmatpush.bf16.msra.mxu3 %v1070_v20  ;;  %v1051_v20 = vld [vmem:[%s1611_s0 + $0xb4] sm:$0xf0]  ;;  %v928_v24 = vld [vmem:[%s1611_s0 + $0xb8] sm:$0xf0]  ;;  %v559_v30 = vld [vmem:[%s1613_s2 + $0xf0] sm:$0xff] }
  0x1f   :  { %v555_v31 = vld [vmem:[%s1613_s2 + $0xd0] sm:$0xff]  ;;  %v558_v32 = vld [vmem:[%s1613_s2 + $0xe8] sm:$0xff]  ;;  %v870_v33 = vld [vmem:[%s1611_s0 + $0x40] sm:$0xf] }
  0x20   :  { %357 = vmatpush.bf16.msra.mxu0 %v1061_v21  ;;  %v1037_v34 = vld [vmem:[%s1611_s0 + $0x44] sm:$0xf0]  ;;  %v934_v35 = vld [vmem:[%s1611_s0 + $0xc0] sm:$0xf]  ;;  %v878_v45 = vld [vmem:[%s1611_s0 + $0x50] sm:$0xf] }
  0x21   :  { %1177 = vmatpush.bf16.msra.mxu2 %v1061_v21  ;;  %446 = vmatpush.bf16.msra.mxu1 %v1069_v22  ;;  %v1034_v21 = vld [vmem:[%s1611_s0 + $0x34] sm:$0xf]  ;;  %v1055_v48 = vld [vmem:[%s1611_s0 + $0xd4] sm:$0xf0]  ;;  %v944_v52 = vld [vmem:[%s1611_s0 + $0xd8] sm:$0xf0] }
  0x22   :  { %1185 = vmatpush.bf16.msra.mxu3 %v1069_v22  ;;  %613 = vperm.xlu1 %1193, %v539_v28   ;;  %v864_v22 = vld [vmem:[%s1611_s0 + $0x38] sm:$0xf0]  ;;  %v1038_v49 = vld [vmem:[%s1611_s0 + $0x54] sm:$0xf]  ;;  %v1040_v61 = vld [vmem:[%s1611_s0 + $0x64] sm:$0xf] }
  0x23   :  { %608 = vperm.xlu0 %1192, %v538_v29   ;;  %618 = vperm.xlu2 %1194, %v540_v42   ;;  %v867_v27 = vor.u32 %v1034_v21, %v864_v22  ;;  %v560_v29 = vld [vmem:[%s1613_s2 + $0xf8] sm:$0xff]  ;;  %v1054_v51 = vld [vmem:[%s1611_s0 + $0xd4] sm:$0xf]  ;;  %v1056_v1 = vld [vmem:[%s1611_s0 + $0xe4] sm:$0xf] }
  0x24   :  { %358 = vmatpush.bf16.msra.mxu0 %v1060_v23  ;;  %v952_v2 = vld [vmem:[%s1611_s0 + $0xe8] sm:$0xf0]  ;;  %v1042_v14 = vld [vmem:[%s1611_s0 + $0x74] sm:$0xf] }
  0x25   :  { %1178 = vmatpush.bf16.msra.mxu2 %v1060_v23  ;;  %447 = vmatpush.bf16.msra.mxu1 %v1068_v26  ;;  %v1050_v23 = vld [vmem:[%s1611_s0 + $0xb4] sm:$0xf]  ;;  %v955_v6 = vor.u32 %v1056_v1, %v952_v2 }
  0x26   :  { %1186 = vmatpush.bf16.msra.mxu3 %v1068_v26  ;;  %v927_v26 = vor.u32 %v1051_v20, %v926_v19  ;;  %v931_v28 = vor.u32 %v1050_v23, %v928_v24  ;;  %v1058_v16 = vld [vmem:[%s1611_s0 + $0xf4] sm:$0xf] }
  0x27   :  { %359 = vmatmul.bf16.vlgmr.msra.gmra.mxu0 %v839_v36  ;;  %v1053_v36 = vld [vmem:[%s1611_s0 + $0xc4] sm:$0xf0] }
  0x28   :  { %399 = vmatmul.bf16.vlgmr.msra.gmra.mxu2 %v903_v37  ;;  %448 = vmatmul.bf16.vlgmr.msra.gmra.mxu1 %v843_v38  ;;  %v1036_v37 = vld [vmem:[%s1611_s0 + $0x44] sm:$0xf]  ;;  %v872_v38 = vld [vmem:[%s1611_s0 + $0x48] sm:$0xf0]  ;;  %v935_v42 = vor.u32 %v1053_v36, %v934_v35 }
  0x29   :  { %488 = vmatmul.bf16.vlgmr.msra.gmra.mxu3 %v907_v39  ;;  %v1052_v39 = vld [vmem:[%s1611_s0 + $0xc4] sm:$0xf]  ;;  %v875_v43 = vor.u32 %v1036_v37, %v872_v38 }
  0x2a   :  { %628 = vperm.xlu1 %1193, %v542_v40   ;;  %v936_v40 = vld [vmem:[%s1611_s0 + $0xc8] sm:$0xf0] }
  0x2b   :  { %623 = vperm.xlu0 %1192, %v541_v41   ;;  %633 = vperm.xlu2 %1194, %v543_v50   ;;  %v871_v41 = vor.u32 %v1037_v34, %v870_v33  ;;  %v939_v44 = vor.u32 %v1052_v39, %v936_v40  ;;  %v880_v50 = vld [vmem:[%s1611_s0 + $0x58] sm:$0xf0] }
  0x32   :  { %643 = vperm.xlu1 %1193, %v545_v46   ;;  %v1039_v46 = vld [vmem:[%s1611_s0 + $0x54] sm:$0xf0] }
  0x33   :  { %638 = vperm.xlu0 %1192, %v544_v47   ;;  %648 = vperm.xlu2 %1194, %v546_v60   ;;  %v942_v47 = vld [vmem:[%s1611_s0 + $0xd0] sm:$0xf]  ;;  %v879_v53 = vor.u32 %v1039_v46, %v878_v45  ;;  %v1057_v60 = vld [vmem:[%s1611_s0 + $0xe4] sm:$0xf0] }
  0x37   :  { %364 = vmatmul.bf16.gmra.mxu0 %v847_v54  ;;  %v943_v54 = vor.u32 %v1055_v48, %v942_v47 }
  0x38   :  { %404 = vmatmul.bf16.gmra.mxu2 %v911_v55  ;;  %453 = vmatmul.bf16.gmra.mxu1 %v851_v56  ;;  %v883_v55 = vor.u32 %v1038_v49, %v880_v50  ;;  %v947_v56 = vor.u32 %v1054_v51, %v944_v52 }
  0x39   :  { %493 = vmatmul.bf16.gmra.mxu3 %v915_v57  ;;  %v886_v57 = vld [vmem:[%s1611_s0 + $0x60] sm:$0xf] }
  0x3a   :  { %658 = vperm.xlu1 %1193, %v548_v58   ;;  %v1041_v58 = vld [vmem:[%s1611_s0 + $0x64] sm:$0xf0] }
  0x3b   :  { %653 = vperm.xlu0 %1192, %v547_v59   ;;  %663 = vperm.xlu2 %1194, %v549_v13   ;;  %v950_v59 = vld [vmem:[%s1611_s0 + $0xe0] sm:$0xf]  ;;  %v887_v3 = vor.u32 %v1041_v58, %v886_v57  ;;  %v1059_v13 = vld [vmem:[%s1611_s0 + $0xf4] sm:$0xf0] }
  0x3c   :  { %v951_v4 = vor.u32 %v1057_v60, %v950_v59 }
  0x42   :  { %673 = vperm.xlu1 %1193, %v551_v63  }
  0x43   :  { %668 = vperm.xlu0 %1192, %v550_v0   ;;  %678 = vperm.xlu2 %1194, %v552_v15   ;;  %v888_v0 = vld [vmem:[%s1611_s0 + $0x68] sm:$0xf0]  ;;  %v896_v15 = vld [vmem:[%s1611_s0 + $0x78] sm:$0xf0] }
  0x44   :  { %v891_v5 = vor.u32 %v1040_v61, %v888_v0  ;;  %v899_v21 = vor.u32 %v1042_v14, %v896_v15 }
  0x47   :  { %369 = vmatmul.bf16.gmra.mxu0 %v855_v7 }
  0x48   :  { %409 = vmatmul.bf16.gmra.mxu2 %v919_v8  ;;  %458 = vmatmul.bf16.gmra.mxu1 %v859_v9 }
  0x49   :  { %498 = vmatmul.bf16.gmra.mxu3 %v923_v10  ;;  %v894_v10 = vld [vmem:[%s1611_s0 + $0x70] sm:$0xf] }
  0x4a   :  { %688 = vperm.xlu1 %1193, %v554_v11   ;;  %v1043_v11 = vld [vmem:[%s1611_s0 + $0x74] sm:$0xf0] }
  0x4b   :  { %683 = vperm.xlu0 %1192, %v553_v12   ;;  %693 = vperm.xlu2 %1194, %v555_v31   ;;  %v958_v12 = vld [vmem:[%s1611_s0 + $0xf0] sm:$0xf]  ;;  %v895_v19 = vor.u32 %v1043_v11, %v894_v10 }
  0x4c   :  { %v959_v20 = vor.u32 %v1059_v13, %v958_v12 }
  0x52   :  { %703 = vperm.xlu1 %1193, %v557_v17   ;;  %v960_v17 = vld [vmem:[%s1611_s0 + $0xf8] sm:$0xf0]  ;;  %s1251_s0 = smov [#allocation5]  }
  0x53   :  { %698 = vperm.xlu0 %1192, %v556_v18   ;;  %708 = vperm.xlu2 %1194, %v558_v32   ;;  %v963_v22 = vor.u32 %v1058_v16, %v960_v17  ;;  %s821_s2 = sshll.u32 %s1251_s0, 4  ;;  %s822_s2 = int_to_ptr.vmem [resolvable:$true] %s821_s2 }
  0x57   :  { %374 = vmatmul.bf16.gmra.mxu0 %v863_v25 }
  0x58   :  { %414 = vmatmul.bf16.gmra.mxu2 %v927_v26  ;;  %463 = vmatmul.bf16.gmra.mxu1 %v867_v27 }
  0x59   :  { %503 = vmatmul.bf16.gmra.mxu3 %v931_v28 }
  0x5a   :  { %718 = vperm.xlu1 %1193, %v560_v29  }
  0x5b   :  { %713 = vperm.xlu0 %1192, %v559_v30  }
  0x65   :  { %v1533_v62 = vpop.permute.xlu2 %583 }
  0x67   :  { %379 = vmatmul.bf16.gmra.mxu0 %v871_v41 }
  0x68   :  { %419 = vmatmul.bf16.gmra.mxu2 %v935_v42  ;;  %468 = vmatmul.bf16.gmra.mxu1 %v875_v43 }
  0x69   :  { %508 = vmatmul.bf16.gmra.mxu3 %v939_v44 }
  0x6d   :  { %v1546_v8 = vpop.permute.xlu2 %588 }
  0x75   :  { %v1572_v23 = vpop.permute.xlu2 %603 }
  0x77   :  { %384 = vmatmul.bf16.gmra.mxu0 %v879_v53 }
  0x78   :  { %424 = vmatmul.bf16.gmra.mxu2 %v943_v54  ;;  %473 = vmatmul.bf16.gmra.mxu1 %v883_v55 }
  0x79   :  { %513 = vmatmul.bf16.gmra.mxu3 %v947_v56 }
  0x7c   :  { %v1535_v63 = vpop.permute.xlu1 %573 }
  0x7d   :  { %v564_v7 = vpop.permute.xlu0 %563  ;;  %v1578_v26 = vpop.permute.xlu2 %618 }
  0x84   :  { %v579_v9 = vpop.permute.xlu1 %578 }
  0x85   :  { %v569_v18 = vpop.permute.xlu0 %568  ;;  %v1584_v31 = vpop.permute.xlu2 %633 }
  0x87   :  { %389 = vmatmul.bf16.gmra.mxu0 %v887_v3 }
  0x88   :  { %429 = vmatmul.bf16.gmra.mxu2 %v951_v4  ;;  %478 = vmatmul.bf16.gmra.mxu1 %v891_v5 }
  0x89   :  { %518 = vmatmul.bf16.gmra.mxu3 %v955_v6 }
  0x8c   :  { %v1574_v24 = vpop.permute.xlu1 %598 }
  0x8d   :  { %v1576_v25 = vpop.permute.xlu0 %593  ;;  %v649_v45 = vpop.permute.xlu2 %648 }
  0x94   :  { %v1580_v27 = vpop.permute.xlu1 %613 }
  0x95   :  { %v1582_v30 = vpop.permute.xlu0 %608 }
  0x97   :  { %394 = vmatmul.bf16.gmra.mxu0 %v895_v19 }
  0x98   :  { %434 = vmatmul.bf16.gmra.mxu2 %v959_v20  ;;  %483 = vmatmul.bf16.gmra.mxu1 %v899_v21 }
  0x99   :  { %523 = vmatmul.bf16.gmra.mxu3 %v963_v22 }
  0x9c   :  { %v1586_v32 = vpop.permute.xlu1 %628 }
  0x9d   :  { %v1588_v41 = vpop.permute.xlu0 %623 }
  0xa4   :  { %v360_v28 = vpop.f32.mrf.mxu0  ;;  %v644_v46 = vpop.permute.xlu1 %643 }
  0xa5   :  { %v449_v29 = vpop.f32.mrf.mxu1  ;;  %v1590_v55 = vpop.permute.xlu0 %638 }
  0xa6   :  { %v450_v35 = vadd.f32 %v449_v29, %v360_v28 }
  0xa8   :  { %v721_v39 = vmul.f32 %v564_v7, %v450_v35 }
  0xab   :  { %v400_v33 = vpop.f32.mrf.mxu2 }
  0xac   :  { %v489_v34 = vpop.f32.mrf.mxu3  ;;  %v362_v36 = vpop.f32.mrf.mxu0 }
  0xad   :  { %v451_v37 = vpop.f32.mrf.mxu1  ;;  %v490_v42 = vadd.f32 %v489_v34, %v400_v33  ;;  %v659_v5 = vpop.permute.xlu1 %658 }
  0xae   :  { %v452_v38 = vadd.f32 %v451_v37, %v362_v36  ;;  %v654_v10 = vpop.permute.xlu0 %653  ;;  %v664_v33 = vpop.permute.xlu2 %663 }
  0xaf   :  { %v737_v51 = vmul.f32 %v644_v46, %v490_v42 }
  0xb0   :  { %v722_v40 = vmul.f32 %v569_v18, %v452_v38 }
  0xb2   :  { %v1079_v43 = vpack.c.bf16 %v722_v40, %v721_v39 }
  0xb3   :  { %v402_v44 = vpop.f32.mrf.mxu2 }
  0xb4   :  { %v491_v47 = vpop.f32.mrf.mxu3  ;;  %1080 = vst [vmem:[#allocation5] sm:$0xff] %v1079_v43   ;;  %v365_v49 = vpop.f32.mrf.mxu0 }
  0xb5   :  { %v492_v48 = vadd.f32 %v491_v47, %v402_v44  ;;  %v454_v50 = vpop.f32.mrf.mxu1 }
  0xb6   :  { %v455_v57 = vadd.f32 %v454_v50, %v365_v49  ;;  %v669_v36 = vpop.permute.xlu0 %668 }
  0xb7   :  { %v738_v52 = vmul.f32 %v649_v45, %v492_v48 }
  0xb8   :  { %v723_v61 = vmul.f32 %v1535_v63, %v455_v57 }
  0xb9   :  { %v1119_v53 = vpack.c.bf16 %v738_v52, %v737_v51  ;;  %v679_v52 = vpop.permute.xlu2 %678 }
  0xbb   :  { %1163 = vst [vmem:[#allocation5 + $0x40] sm:$0xff] %v1119_v53   ;;  %v405_v54 = vpop.f32.mrf.mxu2 }
  0xbc   :  { %v494_v56 = vpop.f32.mrf.mxu3  ;;  %v367_v58 = vpop.f32.mrf.mxu0 }
  0xbd   :  { %v456_v59 = vpop.f32.mrf.mxu1  ;;  %v495_v1 = vadd.f32 %v494_v56, %v405_v54  ;;  %v674_v56 = vpop.permute.xlu1 %673 }
  0xbe   :  { %v457_v60 = vadd.f32 %v456_v59, %v367_v58 }
  0xbf   :  { %v739_v12 = vmul.f32 %v654_v10, %v495_v1 }
  0xc0   :  { %v724_v0 = vmul.f32 %v579_v9, %v457_v60 }
  0xc2   :  { %v1084_v2 = vpack.c.bf16 %v724_v0, %v723_v61 }
  0xc3   :  { %v407_v3 = vpop.f32.mrf.mxu2 }
  0xc4   :  { %v496_v4 = vpop.f32.mrf.mxu3  ;;  %1156 = vst [vmem:[#allocation5 + $0x8] sm:$0xff] %v1084_v2   ;;  %v370_v7 = vpop.f32.mrf.mxu0 }
  0xc5   :  { %v497_v6 = vadd.f32 %v496_v4, %v407_v3  ;;  %v459_v11 = vpop.f32.mrf.mxu1 }
  0xc6   :  { %v460_v17 = vadd.f32 %v459_v11, %v370_v7  ;;  %v689_v11 = vpop.permute.xlu1 %688 }
  0xc7   :  { %v740_v13 = vmul.f32 %v659_v5, %v497_v6 }
  0xc8   :  { %v725_v19 = vmul.f32 %v1533_v62, %v460_v17 }
  0xc9   :  { %v1124_v14 = vpack.c.bf16 %v740_v13, %v739_v12 }
  0xcb   :  { %1164 = vst [vmem:[#allocation5 + $0x48] sm:$0xff] %v1124_v14   ;;  %v410_v15 = vpop.f32.mrf.mxu2  ;;  %v684_v14 = vpop.permute.xlu0 %683 }
  0xcc   :  { %v499_v16 = vpop.f32.mrf.mxu3  ;;  %v372_v18 = vpop.f32.mrf.mxu0 }
  0xcd   :  { %v461_v63 = vpop.f32.mrf.mxu1  ;;  %v500_v21 = vadd.f32 %v499_v16, %v410_v15 }
  0xce   :  { %v462_v9 = vadd.f32 %v461_v63, %v372_v18 }
  0xcf   :  { %v741_v38 = vmul.f32 %v664_v33, %v500_v21 }
  0xd0   :  { %v726_v20 = vmul.f32 %v1546_v8, %v462_v9 }
  0xd2   :  { %v1089_v22 = vpack.c.bf16 %v726_v20, %v725_v19 }
  0xd3   :  { %v412_v28 = vpop.f32.mrf.mxu2 }
  0xd4   :  { %v501_v29 = vpop.f32.mrf.mxu3  ;;  %1157 = vst [vmem:[#allocation5 + $0x10] sm:$0xff] %v1089_v22   ;;  %v375_v35 = vpop.f32.mrf.mxu0 }
  0xd5   :  { %v502_v34 = vadd.f32 %v501_v29, %v412_v28  ;;  %v464_v37 = vpop.f32.mrf.mxu1 }
  0xd6   :  { %v465_v44 = vadd.f32 %v464_v37, %v375_v35  ;;  %v694_v35 = vpop.permute.xlu2 %693 }
  0xd7   :  { %v742_v39 = vmul.f32 %v669_v36, %v502_v34 }
  0xd8   :  { %v727_v46 = vmul.f32 %v1576_v25, %v465_v44 }
  0xd9   :  { %v1129_v40 = vpack.c.bf16 %v742_v39, %v741_v38  ;;  %v699_v38 = vpop.permute.xlu0 %698 }
  0xdb   :  { %1165 = vst [vmem:[#allocation5 + $0x50] sm:$0xff] %v1129_v40   ;;  %v415_v42 = vpop.f32.mrf.mxu2 }
  0xdc   :  { %v504_v43 = vpop.f32.mrf.mxu3  ;;  %v377_v62 = vpop.f32.mrf.mxu0 }
  0xdd   :  { %v466_v45 = vpop.f32.mrf.mxu1  ;;  %v505_v48 = vadd.f32 %v504_v43, %v415_v42 }
  0xde   :  { %v467_v8 = vadd.f32 %v466_v45, %v377_v62 }
  0xdf   :  { %v743_v58 = vmul.f32 %v674_v56, %v505_v48  ;;  %v704_v56 = vpop.permute.xlu1 %703 }
  0xe0   :  { %v728_v47 = vmul.f32 %v1574_v24, %v467_v8 }
  0xe2   :  { %v1094_v49 = vpack.c.bf16 %v728_v47, %v727_v46 }
  0xe3   :  { %v417_v50 = vpop.f32.mrf.mxu2 }
  0xe4   :  { %v506_v51 = vpop.f32.mrf.mxu3  ;;  %1158 = vst [vmem:[#allocation5 + $0x18] sm:$0xff] %v1094_v49   ;;  %v380_v54 = vpop.f32.mrf.mxu0 }
  0xe5   :  { %v507_v53 = vadd.f32 %v506_v51, %v417_v50  ;;  %v469_v57 = vpop.f32.mrf.mxu1 }
  0xe6   :  { %v470_v1 = vadd.f32 %v469_v57, %v380_v54 }
  0xe7   :  { %v744_v59 = vmul.f32 %v679_v52, %v507_v53  ;;  %v709_v52 = vpop.permute.xlu2 %708 }
  0xe8   :  { %v729_v3 = vmul.f32 %v1572_v23, %v470_v1 }
  0xe9   :  { %v1134_v60 = vpack.c.bf16 %v744_v59, %v743_v58 }
  0xeb   :  { %1166 = vst [vmem:[#allocation5 + $0x58] sm:$0xff] %v1134_v60   ;;  %v420_v61 = vpop.f32.mrf.mxu2 }
  0xec   :  { %v509_v0 = vpop.f32.mrf.mxu3  ;;  %v382_v25 = vpop.f32.mrf.mxu0 }
  0xed   :  { %v471_v2 = vpop.f32.mrf.mxu1  ;;  %v510_v5 = vadd.f32 %v509_v0, %v420_v61 }
  0xee   :  { %v472_v24 = vadd.f32 %v471_v2, %v382_v25 }
  0xef   :  { %v745_v16 = vmul.f32 %v684_v14, %v510_v5 }
  0xf0   :  { %v730_v4 = vmul.f32 %v1582_v30, %v472_v24 }
  0xf2   :  { %v1099_v6 = vpack.c.bf16 %v730_v4, %v729_v3 }
  0xf3   :  { %v422_v7 = vpop.f32.mrf.mxu2 }
  0xf4   :  { %v511_v10 = vpop.f32.mrf.mxu3  ;;  %1159 = vst [vmem:[#allocation5 + $0x20] sm:$0xff] %v1099_v6   ;;  %v385_v13 = vpop.f32.mrf.mxu0 }
  0xf5   :  { %v512_v12 = vadd.f32 %v511_v10, %v422_v7  ;;  %v474_v15 = vpop.f32.mrf.mxu1  ;;  %v719_v10 = vpop.permute.xlu1 %718 }
  0xf6   :  { %v475_v19 = vadd.f32 %v474_v15, %v385_v13 }
  0xf7   :  { %v746_v17 = vmul.f32 %v689_v11, %v512_v12  ;;  %v714_v11 = vpop.permute.xlu0 %713 }
  0xf8   :  { %v731_v21 = vmul.f32 %v1580_v27, %v475_v19 }
  0xf9   :  { %v1139_v18 = vpack.c.bf16 %v746_v17, %v745_v16 }
  0xfb   :  { %1167 = vst [vmem:[#allocation5 + $0x60] sm:$0xff] %v1139_v18   ;;  %v425_v63 = vpop.f32.mrf.mxu2 }
  0xfc   :  { %v514_v9 = vpop.f32.mrf.mxu3  ;;  %v387_v23 = vpop.f32.mrf.mxu0 }
  0xfd   :  { %v476_v20 = vpop.f32.mrf.mxu1  ;;  %v515_v28 = vadd.f32 %v514_v9, %v425_v63 }
  0xfe   :  { %v477_v30 = vadd.f32 %v476_v20, %v387_v23 }
  0xff   :  { %v747_v40 = vmul.f32 %v694_v35, %v515_v28 }
 0x100   :  { %v732_v22 = vmul.f32 %v1578_v26, %v477_v30 }
 0x102   :  { %v1104_v29 = vpack.c.bf16 %v732_v22, %v731_v21 }
 0x103   :  { %v427_v33 = vpop.f32.mrf.mxu2 }
 0x104   :  { %v516_v34 = vpop.f32.mrf.mxu3  ;;  %1160 = vst [vmem:[#allocation5 + $0x28] sm:$0xff] %v1104_v29   ;;  %v390_v37 = vpop.f32.mrf.mxu0 }
 0x105   :  { %v517_v36 = vadd.f32 %v516_v34, %v427_v33  ;;  %v479_v39 = vpop.f32.mrf.mxu1 }
 0x106   :  { %v480_v45 = vadd.f32 %v479_v39, %v390_v37 }
 0x107   :  { %v748_v42 = vmul.f32 %v699_v38, %v517_v36 }
 0x108   :  { %v733_v46 = vmul.f32 %v1588_v41, %v480_v45 }
 0x109   :  { %v1144_v43 = vpack.c.bf16 %v748_v42, %v747_v40 }
 0x10b   :  { %1168 = vst [vmem:[#allocation5 + $0x68] sm:$0xff] %v1144_v43   ;;  %v430_v44 = vpop.f32.mrf.mxu2 }
 0x10c   :  { %v519_v62 = vpop.f32.mrf.mxu3  ;;  %v392_v27 = vpop.f32.mrf.mxu0 }
 0x10d   :  { %v481_v8 = vpop.f32.mrf.mxu1  ;;  %v520_v48 = vadd.f32 %v519_v62, %v430_v44 }
 0x10e   :  { %v482_v26 = vadd.f32 %v481_v8, %v392_v27 }
 0x10f   :  { %v749_v58 = vmul.f32 %v704_v56, %v520_v48 }
 0x110   :  { %v734_v47 = vmul.f32 %v1586_v32, %v482_v26 }
 0x112   :  { %v1109_v49 = vpack.c.bf16 %v734_v47, %v733_v46 }
 0x113   :  { %v432_v50 = vpop.f32.mrf.mxu2 }
 0x114   :  { %v521_v51 = vpop.f32.mrf.mxu3  ;;  %1161 = vst [vmem:[#allocation5 + $0x30] sm:$0xff] %v1109_v49   ;;  %v395_v54 = vpop.f32.mrf.mxu0 }
 0x115   :  { %v522_v53 = vadd.f32 %v521_v51, %v432_v50  ;;  %v484_v57 = vpop.f32.mrf.mxu1 }
 0x116   :  { %v485_v1 = vadd.f32 %v484_v57, %v395_v54 }
 0x117   :  { %v750_v59 = vmul.f32 %v709_v52, %v522_v53 }
 0x118   :  { %v735_v2 = vmul.f32 %v1584_v31, %v485_v1 }
 0x119   :  { %v1149_v60 = vpack.c.bf16 %v750_v59, %v749_v58 }
 0x11b   :  { %1169 = vst [vmem:[#allocation5 + $0x70] sm:$0xff] %v1149_v60   ;;  %v435_v61 = vpop.f32.mrf.mxu2 }
 0x11c   :  { %v524_v0 = vpop.f32.mrf.mxu3  ;;  %v397_v41 = vpop.f32.mrf.mxu0 }
 0x11d   :  { %v486_v25 = vpop.f32.mrf.mxu1  ;;  %v525_v3 = vadd.f32 %v524_v0, %v435_v61 }
 0x11e   :  { %v487_v32 = vadd.f32 %v486_v25, %v397_v41 }
 0x11f   :  { %v751_v12 = vmul.f32 %v714_v11, %v525_v3 }
 0x120   :  { %v736_v24 = vmul.f32 %v1590_v55, %v487_v32 }
 0x122   :  { %v1114_v4 = vpack.c.bf16 %v736_v24, %v735_v2 }
 0x123   :  { %v437_v5 = vpop.f32.mrf.mxu2 }
 0x124   :  { %v526_v6 = vpop.f32.mrf.mxu3  ;;  %1162 = vst [vmem:[#allocation5 + $0x38] sm:$0xff] %v1114_v4  }
 0x125   :  { %v527_v7 = vadd.f32 %v526_v6, %v437_v5 }
 0x127   :  { %v752_v13 = vmul.f32 %v719_v10, %v527_v7 }
 0x129   :  { %v1154_v14 = vpack.c.bf16 %v752_v13, %v751_v12 }
 0x12b   :  { %1170 = vst [vmem:[#allocation5 + $0x78] sm:$0xff] %v1154_v14  }
 0x12c   :  { %829 = dma.vmem_to_hbm [thread:$0]  %s822_s2, 2048, %s824_s28, [#allocation4], %s1248_s17, %s1248_s17, %s1249_s18  }
 0x12d   :  { %1245 = dma.done.wait [#allocation4], 2048  }
 0x12e   :  { %1246 = vsyncadd [#allocation4], 4294965248 }
 0x12f   :  { %834 = vsyncpa [#allocation3], 1 }
 0x130   :  { %835 = vsyncpa [#allocation4], 1 }

</bundles_post_ra>
